<compile_context>
chip_gen: v7x
topology: tpu7x:2x2x1
jax: 0.10.0
libtpu: 0.0.40
codegen_flags: <defaults>
</compile_context>

<pallas_src>
import functools

import jax
import jax.numpy as jnp
import numpy as np
from jax.experimental import pallas as pl
from jax.experimental.pallas import tpu as pltpu

# ---------------------------------------------------------------------------
# Problem sizes (small, consistent with the module's forward)
# ---------------------------------------------------------------------------
NUM_ATOM_TYPES = 100     # nn.Embedding(100, atom_features)
EMB_ROWS_PAD = 128       # lane-aligned one-hot contraction
ATOM_FEATURES = 32
HIDDEN_DIM = 64
OUTPUT_DIM = 128
MAX_ATOMS = 8
BN_EPS = 1e-5
NUM_LAYERS = 3
NUM_PHASES = NUM_LAYERS + 1     # 3 conv/BN layers + 1 readout phase
CHUNK_ROWS_TARGET = 256         # target rows per block-diagonal adjacency tile


# ---------------------------------------------------------------------------
# Pallas kernel: grid = (phase, chunk)
# ---------------------------------------------------------------------------
def _encoder_kernel(ids_ref, adj_ref, mask_ref, emb_ref, w_ref, bgb_ref,
                    wo_ref, bo_ref, out_ref,
                    x_sc, s1_sc, s2_sc, scale_sc, shift_sc,
                    *, n_rows_true, atoms, mxu_dtype):
    f32 = jnp.float32
    p = pl.program_id(0)                     # phase: 0..2 conv layers, 3 readout
    c = pl.program_id(1)                     # molecule chunk
    nc = pl.num_programs(1)
    chunk, hid = x_sc.shape[1], x_sc.shape[2]
    mpc = chunk // atoms                     # molecules per chunk
    n_emb_rows = emb_ref.shape[0]
    inv_n = f32(1.0 / n_rows_true)           # true (unpadded) batch*atoms rows

    @pl.when(jnp.logical_and(p == 0, c == 0))
    def _init():
        # Deterministic values for the (discarded) normalize path in phase 0.
        scale_sc[...] = jnp.ones_like(scale_sc)
        shift_sc[...] = jnp.zeros_like(shift_sc)

    @pl.when(p < NUM_LAYERS)
    def _conv_layer():
        @pl.when(c == 0)
        def _reset_stats():
            s1_sc[...] = jnp.zeros_like(s1_sc)
            s2_sc[...] = jnp.zeros_like(s2_sc)

        # Chunk input: lane-aligned one-hot embedding lookup (layer 0) or the
        # previous layer's stored activations, normalized lazily with the BN
        # affine finalized at the end of the previous phase.
        ids = ids_ref[...]                                        # (chunk, 1) int32
        iota = jax.lax.broadcasted_iota(jnp.int32, (chunk, n_emb_rows), 1)
        onehot = (iota == ids).astype(mxu_dtype)                  # (chunk, 128)
        x_emb = jnp.dot(onehot, emb_ref[...], preferred_element_type=f32)
        x_prev = x_sc[c] * scale_sc[...] + shift_sc[...]
        x = jnp.where(p == 0, x_emb, x_prev)                      # (chunk, hid) f32

        # Message passing: one MXU-sized block-diagonal tile per chunk.
        msg = jnp.dot(adj_ref[...], x.astype(mxu_dtype),
                      preferred_element_type=f32)                 # (chunk, hid)
        w = w_ref[p]                                              # (hid, hid)
        bgb = bgb_ref[p]                                          # (3, hid): bias, gamma, beta
        h = jnp.dot(msg.astype(mxu_dtype), w,
                    preferred_element_type=f32) + bgb[0:1]
        h = jnp.maximum(h, 0.0)                                   # ReLU (f32 VPU)
        h = h * mask_ref[...]                                     # zero padded rows

        x_sc[c] = h                                               # store pre-BN activations
        s1_sc[...] += jnp.sum(h, axis=0, keepdims=True)
        s2_sc[...] += jnp.sum(h * h, axis=0, keepdims=True)

        # Finalize whole-batch BatchNorm affine at the last chunk of the layer.
        @pl.when(c == nc - 1)
        def _finalize_bn():
            mean = s1_sc[...] * inv_n
            var = s2_sc[...] * inv_n - mean * mean                # biased, single-pass
            scale = bgb[1:2] * jax.lax.rsqrt(var + BN_EPS)
            scale_sc[...] = scale
            shift_sc[...] = bgb[2:3] - mean * scale

    @pl.when(p == NUM_PHASES - 1)
    def _readout():
        xn = x_sc[c] * scale_sc[...] + shift_sc[...]              # BN of layer 3
        pooled = jnp.sum(xn.reshape(mpc, atoms, hid), axis=1) * f32(1.0 / atoms)
        out = jnp.dot(pooled.astype(mxu_dtype), wo_ref[...],
                      preferred_element_type=f32) + bo_ref[...]   # (mpc, O)
        out_ref[...] = out


# ---------------------------------------------------------------------------
# Wrapper: chunking, padding/masking, param packing, pallas_call
# ---------------------------------------------------------------------------
def molecular_graph_encoder(atomic_nums, adjacency, params, *,
                            mxu_dtype=jnp.bfloat16,
                            chunk_rows_target=CHUNK_ROWS_TARGET):
    f32 = jnp.float32
    B, A = atomic_nums.shape
    F = params["emb"].shape[1]
    H = params["w1"].shape[1]
    O = params["wo"].shape[1]
    # TODO(synk): handle atom_features > hidden_dim (needs column-padded
    # activations); the module's defaults (32 <= 128) satisfy this.
    assert F <= H, "kernel assumes atom_features <= hidden_dim"

    # ---- chunking: group molecules into MXU-sized block-diagonal tiles ----
    mpc = max(1, min(B, chunk_rows_target // A))      # molecules per chunk
    nc = -(-B // mpc)
    if nc > 1 and mpc % 8 != 0:                       # keep out blocks sublane-aligned
        mpc = max(8, (mpc // 8) * 8)
        nc = -(-B // mpc)
    B_pad = nc * mpc
    chunk = mpc * A

    # ---- inputs: pad molecules, build per-chunk block-diagonal adjacency ---
    ids = atomic_nums.astype(jnp.int32)
    ids = jnp.pad(ids, ((0, B_pad - B), (0, 0)), constant_values=NUM_ATOM_TYPES)
    ids = ids.reshape(nc, chunk, 1)

    mol_valid = (jnp.arange(B_pad) < B).astype(f32)
    mask = jnp.repeat(mol_valid, A).reshape(nc, chunk, 1)

    adjp = jnp.pad(adjacency.astype(f32), ((0, B_pad - B), (0, 0), (0, 0)))
    adjp = adjp.reshape(nc, mpc, A, A)
    eye_m = jnp.eye(mpc, dtype=f32)
    adj_cd = jnp.einsum("cmij,mn->cminj", adjp, eye_m)        # per-chunk block-diag;
    adj_cd = adj_cd.reshape(nc, chunk, chunk).astype(mxu_dtype)  # no (B,A,B,A) temp

    # ---- params: embedding padded to (128, H); layer-1 weight padded to (H, H)
    emb_pad = jnp.zeros((EMB_ROWS_PAD, H), f32).at[:NUM_ATOM_TYPES, :F].set(params["emb"])
    emb_pad = emb_pad.astype(mxu_dtype)
    w1p = jnp.zeros((H, H), f32).at[:F, :].set(params["w1"])
    w_stack = jnp.stack([w1p, params["w2"], params["w3"]]).astype(mxu_dtype)  # (3,H,H)
    bgb = jnp.stack([
        jnp.stack([params["b1"][0], params["g1"][0], params["be1"][0]]),
        jnp.stack([params["b2"][0], params["g2"][0], params["be2"][0]]),
        jnp.stack([params["b3"][0], params["g3"][0], params["be3"][0]]),
    ]).astype(f32)                                                            # (3,3,H)
    wo = params["wo"].astype(mxu_dtype)                                       # (H, O)
    bo = params["bo"].astype(f32)                                             # (1, O)

    kernel = functools.partial(_encoder_kernel, n_rows_true=B * A, atoms=A,
                               mxu_dtype=mxu_dtype)

    chunk_idx = lambda p_, c_: (c_, 0, 0)
    const2 = lambda p_, c_: (0, 0)
    const3 = lambda p_, c_: (0, 0, 0)
    grid_spec = pltpu.PrefetchScalarGridSpec(
        num_scalar_prefetch=0,
        grid=(NUM_PHASES, nc),
        in_specs=[
            pl.BlockSpec((None, chunk, 1), chunk_idx),        # atom ids
            pl.BlockSpec((None, chunk, chunk), chunk_idx),    # block-diag adjacency tile
            pl.BlockSpec((None, chunk, 1), chunk_idx),        # row-validity mask
            pl.BlockSpec((EMB_ROWS_PAD, H), const2),          # embedding (resident)
            pl.BlockSpec((NUM_LAYERS, H, H), const3),         # conv weights (resident)
            pl.BlockSpec((NUM_LAYERS, 3, H), const3),         # bias/gamma/beta (resident)
            pl.BlockSpec((H, O), const2),                     # output weight (resident)
            pl.BlockSpec((1, O), const2),                     # output bias (resident)
        ],
        out_specs=pl.BlockSpec(
            (mpc, O), lambda p_, c_: (jnp.where(p_ == NUM_PHASES - 1, c_, 0), 0)),
        scratch_shapes=[
            pltpu.VMEM((nc, chunk, H), f32),   # resident activations (all chunks)
            pltpu.VMEM((1, H), f32),           # BN sum
            pltpu.VMEM((1, H), f32),           # BN sum of squares
            pltpu.VMEM((1, H), f32),           # BN scale = gamma * rsqrt(var+eps)
            pltpu.VMEM((1, H), f32),           # BN shift = beta - mean*scale
        ],
    )

    # Explicit scoped-VMEM limit (defaults differ across v5e/v6e/v7x).
    itemsize = jnp.dtype(mxu_dtype).itemsize
    est_vmem = (2 * (chunk * chunk * itemsize + 2 * chunk * 4)     # pipelined chunk inputs
                + EMB_ROWS_PAD * H * itemsize + NUM_LAYERS * H * H * itemsize
                + NUM_LAYERS * 3 * H * 4 + H * O * itemsize + O * 4
                + 2 * mpc * O * 4                                  # output block
                + nc * chunk * H * 4 + 4 * H * 4)                  # scratch
    vmem_limit = int(min(56 << 20, max(16 << 20, 2 * est_vmem + (2 << 20))))

    out = pl.pallas_call(
        kernel,
        out_shape=jax.ShapeDtypeStruct((B_pad, O), f32),
        grid_spec=grid_spec,
        compiler_params=pltpu.CompilerParams(
            dimension_semantics=("arbitrary", "arbitrary"),
            vmem_limit_bytes=vmem_limit),
    )(ids, adj_cd, mask, emb_pad, w_stack, bgb, wo, bo)
    return out[:B]


# ---------------------------------------------------------------------------
# Deterministic parameter init (synthetic; same shapes as the nn.Module)
# ---------------------------------------------------------------------------
def init_params(key):
    keys = jax.random.split(key, 16)

    def dense(kw, kb, cin, cout):
        w = jax.random.normal(kw, (cin, cout), jnp.float32) * 0.05   # (in, out)
        b = jax.random.normal(kb, (1, cout), jnp.float32) * 0.01
        return w, b

    emb = jax.random.normal(keys[0], (NUM_ATOM_TYPES, ATOM_FEATURES),
                            jnp.float32) * 0.1
    w1, b1 = dense(keys[1], keys[2], ATOM_FEATURES, HIDDEN_DIM)
    w2, b2 = dense(keys[3], keys[4], HIDDEN_DIM, HIDDEN_DIM)
    w3, b3 = dense(keys[5], keys[6], HIDDEN_DIM, HIDDEN_DIM)
    wo, bo = dense(keys[7], keys[8], HIDDEN_DIM, OUTPUT_DIM)

    def bn(kg, kb):
        g = 1.0 + 0.1 * jax.random.normal(kg, (1, HIDDEN_DIM), jnp.float32)
        be = 0.1 * jax.random.normal(kb, (1, HIDDEN_DIM), jnp.float32)
        return g, be

    g1, be1 = bn(keys[9], keys[10])
    g2, be2 = bn(keys[11], keys[12])
    g3, be3 = bn(keys[13], keys[14])
    return dict(emb=emb, w1=w1, b1=b1, g1=g1, be1=be1,
                w2=w2, b2=b2, g2=g2, be2=be2,
                w3=w3, b3=b3, g3=g3, be3=be3,
                wo=wo, bo=bo)


# ---------------------------------------------------------------------------
# Pure-JAX reference (mirrors the PyTorch forward, training-mode batchnorm).
# ---------------------------------------------------------------------------
def reference_forward(atomic_nums, adjacency, p, *, mxu_dtype=jnp.float32):
    f32 = jnp.float32
    c = lambda a: a.astype(mxu_dtype)
    x = c(p["emb"])[atomic_nums].astype(f32)                          # (B, A, F)

    def block(x, w, b, g, be):
        msg = jnp.einsum("bij,bjf->bif", c(adjacency), c(x),
                         preferred_element_type=f32)
        h = jnp.einsum("bif,fo->bio", c(msg), c(w),
                       preferred_element_type=f32) + b
        h = jnp.maximum(h, 0.0)
        mean = jnp.mean(h, axis=(0, 1), keepdims=True)
        var = jnp.mean((h - mean) ** 2, axis=(0, 1), keepdims=True)   # biased
        return (h - mean) * jax.lax.rsqrt(var + BN_EPS) * g + be

    x = block(x, p["w1"], p["b1"], p["g1"], p["be1"])
    x = block(x, p["w2"], p["b2"], p["g2"], p["be2"])
    x = block(x, p["w3"], p["b3"], p["g3"], p["be3"])
    pooled = jnp.mean(x, axis=1)
    return jnp.dot(c(pooled), c(p["wo"]), preferred_element_type=f32) + p["bo"]


if __name__ == "__main__":
    root = jax.random.PRNGKey(0)
    params = init_params(jax.random.fold_in(root, 0))

    def make_inputs(k, batch):
        k_ids, k_adj = jax.random.split(k)
        ids = jax.random.randint(k_ids, (batch, MAX_ATOMS), 1,
                                 NUM_ATOM_TYPES, dtype=jnp.int32)
        raw = jax.random.uniform(k_adj, (batch, MAX_ATOMS, MAX_ATOMS))
        adj = (raw > 0.6).astype(jnp.float32)
        adj = jnp.maximum(adj, jnp.swapaxes(adj, 1, 2))
        adj = jnp.maximum(adj, jnp.eye(MAX_ATOMS, dtype=jnp.float32)[None])
        return ids, adj

    # 1) shipped tiny size (B=2): single chunk, exact f32 MXU path.
    ids_s, adj_s = make_inputs(jax.random.fold_in(root, 1), 2)
    out = jax.block_until_ready(
        molecular_graph_encoder(ids_s, adj_s, params, mxu_dtype=jnp.float32))
    ref = reference_forward(ids_s, adj_s, params, mxu_dtype=jnp.float32)
    np.testing.assert_allclose(np.asarray(out), np.asarray(ref),
                               rtol=1e-3, atol=1e-3)

    # 2) amortized batch (B=50): multi-chunk pipelined grid, molecule padding
    #    + BN masking, still the exact f32 path.
    ids_l, adj_l = make_inputs(jax.random.fold_in(root, 2), 50)
    out = jax.block_until_ready(
        molecular_graph_encoder(ids_l, adj_l, params, mxu_dtype=jnp.float32))
    ref = reference_forward(ids_l, adj_l, params, mxu_dtype=jnp.float32)
    np.testing.assert_allclose(np.asarray(out), np.asarray(ref),
                               rtol=1e-3, atol=1e-3)

    # 3) fast path: bf16 MXU operands, f32 accumulation / f32 BN math; compare
    #    against a reference applying the same operand casts.
    out = jax.block_until_ready(
        molecular_graph_encoder(ids_l, adj_l, params, mxu_dtype=jnp.bfloat16))
    ref = reference_forward(ids_l, adj_l, params, mxu_dtype=jnp.bfloat16)
    np.testing.assert_allclose(np.asarray(out), np.asarray(ref),
                               rtol=2e-2, atol=2e-2)

    print("KERNEL_OK")
</pallas_src>

<mosaic_0001>
module attributes {stable_mosaic.version = 11 : i64} {
  func.func @_encoder_kernel(%arg0: i32, %arg1: i32, %arg2: memref<1x16x1xi32, #tpu.memory_space<vmem>>, %arg3: memref<1x16x16xf32, #tpu.memory_space<vmem>>, %arg4: memref<1x16x1xf32, #tpu.memory_space<vmem>>, %arg5: memref<128x64xf32, #tpu.memory_space<vmem>>, %arg6: memref<3x64x64xf32, #tpu.memory_space<vmem>>, %arg7: memref<3x3x64xf32, #tpu.memory_space<vmem>>, %arg8: memref<64x128xf32, #tpu.memory_space<vmem>>, %arg9: memref<1x128xf32, #tpu.memory_space<vmem>>, %arg10: memref<2x128xf32, #tpu.memory_space<vmem>>, %arg11: memref<1x16x64xf32, #tpu.memory_space<vmem>>, %arg12: memref<1x64xf32, #tpu.memory_space<vmem>>, %arg13: memref<1x64xf32, #tpu.memory_space<vmem>>, %arg14: memref<1x64xf32, #tpu.memory_space<vmem>>, %arg15: memref<1x64xf32, #tpu.memory_space<vmem>>) attributes {dimension_semantics = [#tpu.dimension_semantics<arbitrary>, #tpu.dimension_semantics<arbitrary>], iteration_bounds = array<i64: 4, 1>, scalar_prefetch = 0 : i64, scratch_operands = 5 : i64, tpu.core_type = #tpu.core_type<tc>, window_params = [{transform_indices = @transform_0, window_bounds = array<i64: 1, 16, 1>}, {transform_indices = @transform_1, window_bounds = array<i64: 1, 16, 16>}, {transform_indices = @transform_2, window_bounds = array<i64: 1, 16, 1>}, {pipeline_mode = #tpu.pipeline_mode<synchronous>, transform_indices = @transform_3, window_bounds = array<i64: 128, 64>}, {pipeline_mode = #tpu.pipeline_mode<synchronous>, transform_indices = @transform_4, window_bounds = array<i64: 3, 64, 64>}, {pipeline_mode = #tpu.pipeline_mode<synchronous>, transform_indices = @transform_5, window_bounds = array<i64: 3, 3, 64>}, {pipeline_mode = #tpu.pipeline_mode<synchronous>, transform_indices = @transform_6, window_bounds = array<i64: 64, 128>}, {pipeline_mode = #tpu.pipeline_mode<synchronous>, transform_indices = @transform_7, window_bounds = array<i64: 1, 128>}, {transform_indices = @transform_8, window_bounds = array<i64: 2, 128>}]} {
    %c0_i32 = arith.constant 0 : i32
    %0 = arith.cmpi eq, %arg0, %c0_i32 : i32
    %c0_i32_0 = arith.constant 0 : i32
    %1 = arith.cmpi eq, %arg1, %c0_i32_0 : i32
    %2 = arith.andi %0, %1 : i1
    %3 = arith.extui %2 : i1 to i32
    %c0_i32_1 = arith.constant 0 : i32
    %4 = arith.cmpi ne, %3, %c0_i32_1 : i32
    scf.if %4 {
      %cst_5 = arith.constant 1.000000e+00 : f32
      %11 = vector.broadcast %cst_5 : f32 to vector<1x64xf32>
      %c0 = arith.constant 0 : index
      %c0_6 = arith.constant 0 : index
      %12 = vector.load %arg14[%c0, %c0_6] : memref<1x64xf32, #tpu.memory_space<vmem>>, vector<1x64xf32>
      tpu.vector_store %arg14[%c0, %c0_6], %11 {strides = array<i32>} : memref<1x64xf32, #tpu.memory_space<vmem>>, vector<1x64xf32>,
      %cst_7 = arith.constant 0.000000e+00 : f32
      %13 = vector.broadcast %cst_7 : f32 to vector<1x64xf32>
      %c0_8 = arith.constant 0 : index
      %c0_9 = arith.constant 0 : index
      %14 = vector.load %arg15[%c0_8, %c0_9] : memref<1x64xf32, #tpu.memory_space<vmem>>, vector<1x64xf32>
      tpu.vector_store %arg15[%c0_8, %c0_9], %13 {strides = array<i32>} : memref<1x64xf32, #tpu.memory_space<vmem>>, vector<1x64xf32>,
    } else {
    }
    %c3_i32 = arith.constant 3 : i32
    %5 = arith.cmpi slt, %arg0, %c3_i32 : i32
    %6 = arith.extui %5 : i1 to i32
    %cst = arith.constant 6.250000e-02 : f32
    %c0_i32_2 = arith.constant 0 : i32
    %7 = arith.cmpi ne, %6, %c0_i32_2 : i32
    scf.if %7 {
      %c0_i32_5 = arith.constant 0 : i32
      %11 = arith.cmpi eq, %arg1, %c0_i32_5 : i32
      %12 = arith.extui %11 : i1 to i32
      %c0_i32_6 = arith.constant 0 : i32
      %13 = arith.cmpi ne, %12, %c0_i32_6 : i32
      scf.if %13 {
        %cst_46 = arith.constant 0.000000e+00 : f32
        %71 = vector.broadcast %cst_46 : f32 to vector<1x64xf32>
        %c0_47 = arith.constant 0 : index
        %c0_48 = arith.constant 0 : index
        %72 = vector.load %arg12[%c0_47, %c0_48] : memref<1x64xf32, #tpu.memory_space<vmem>>, vector<1x64xf32>
        tpu.vector_store %arg12[%c0_47, %c0_48], %71 {strides = array<i32>} : memref<1x64xf32, #tpu.memory_space<vmem>>, vector<1x64xf32>,
        %cst_49 = arith.constant 0.000000e+00 : f32
        %73 = vector.broadcast %cst_49 : f32 to vector<1x64xf32>
        %c0_50 = arith.constant 0 : index
        %c0_51 = arith.constant 0 : index
        %74 = vector.load %arg13[%c0_50, %c0_51] : memref<1x64xf32, #tpu.memory_space<vmem>>, vector<1x64xf32>
        tpu.vector_store %arg13[%c0_50, %c0_51], %73 {strides = array<i32>} : memref<1x64xf32, #tpu.memory_space<vmem>>, vector<1x64xf32>,
      } else {
      }
      %c0 = arith.constant 0 : index
      %c0_7 = arith.constant 0 : index
      %c0_8 = arith.constant 0 : index
      %14 = vector.load %arg2[%c0, %c0_7, %c0_8] : memref<1x16x1xi32, #tpu.memory_space<vmem>>, vector<1x16x1xi32>
      %15 = vector.shape_cast %14 : vector<1x16x1xi32> to vector<16x1xi32>
      %16 = tpu.iota {dimensions = array<i32: 1>} : vector<16x128xi32>
      %17 = vector.broadcast %15 : vector<16x1xi32> to vector<16x128xi32>
      %18 = arith.cmpi eq, %16, %17 : vector<16x128xi32>
      %19 = arith.extui %18 : vector<16x128xi1> to vector<16x128xi32>
      %20 = arith.sitofp %19 : vector<16x128xi32> to vector<16x128xf32>
      %c0_9 = arith.constant 0 : index
      %c0_10 = arith.constant 0 : index
      %21 = vector.load %arg5[%c0_9, %c0_10] : memref<128x64xf32, #tpu.memory_space<vmem>>, vector<128x64xf32>
      %cst_11 = arith.constant dense<0.000000e+00> : vector<16x64xf32>
      %22 = tpu.matmul %20, %21, %cst_11 {dimension_numbers = #tpu.dot_dimension_numbers<[1], [0], [0], [1], [0, 0, 1, 1], [], []>} : vector<16x128xf32>, vector<128x64xf32>, vector<16x64xf32> -> vector<16x64xf32>
      %23 = arith.index_cast %arg1 : i32 to index
      %c0_12 = arith.constant 0 : index
      %c0_13 = arith.constant 0 : index
      %24 = vector.load %arg11[%23, %c0_12, %c0_13] : memref<1x16x64xf32, #tpu.memory_space<vmem>>, vector<1x16x64xf32>
      %25 = vector.shape_cast %24 : vector<1x16x64xf32> to vector<16x64xf32>
      %c0_14 = arith.constant 0 : index
      %c0_15 = arith.constant 0 : index
      %26 = vector.load %arg14[%c0_14, %c0_15] : memref<1x64xf32, #tpu.memory_space<vmem>>, vector<1x64xf32>
      %27 = vector.broadcast %26 : vector<1x64xf32> to vector<16x64xf32>
      %28 = arith.mulf %25, %27 : vector<16x64xf32>
      %c0_16 = arith.constant 0 : index
      %c0_17 = arith.constant 0 : index
      %29 = vector.load %arg15[%c0_16, %c0_17] : memref<1x64xf32, #tpu.memory_space<vmem>>, vector<1x64xf32>
      %30 = vector.broadcast %29 : vector<1x64xf32> to vector<16x64xf32>
      %31 = arith.addf %28, %30 : vector<16x64xf32>
      %c0_i32_18 = arith.constant 0 : i32
      %32 = arith.cmpi eq, %arg0, %c0_i32_18 : i32
      %33 = arith.select %32, %22, %31 : vector<16x64xf32>
      %c0_19 = arith.constant 0 : index
      %c0_20 = arith.constant 0 : index
      %c0_21 = arith.constant 0 : index
      %34 = vector.load %arg3[%c0_19, %c0_20, %c0_21] : memref<1x16x16xf32, #tpu.memory_space<vmem>>, vector<1x16x16xf32>
      %35 = vector.shape_cast %34 : vector<1x16x16xf32> to vector<16x16xf32>
      %cst_22 = arith.constant dense<0.000000e+00> : vector<16x64xf32>
      %36 = tpu.matmul %35, %33, %cst_22 {dimension_numbers = #tpu.dot_dimension_numbers<[1], [0], [0], [1], [0, 0, 1, 1], [], []>} : vector<16x16xf32>, vector<16x64xf32>, vector<16x64xf32> -> vector<16x64xf32>
      %37 = arith.index_cast %arg0 : i32 to index
      %c0_23 = arith.constant 0 : index
      %c0_24 = arith.constant 0 : index
      %38 = vector.load %arg6[%37, %c0_23, %c0_24] : memref<3x64x64xf32, #tpu.memory_space<vmem>>, vector<1x64x64xf32>
      %39 = vector.shape_cast %38 : vector<1x64x64xf32> to vector<64x64xf32>
      %40 = arith.index_cast %arg0 : i32 to index
      %c0_25 = arith.constant 0 : index
      %c0_26 = arith.constant 0 : index
      %41 = vector.load %arg7[%40, %c0_25, %c0_26] : memref<3x3x64xf32, #tpu.memory_space<vmem>>, vector<1x3x64xf32>
      %42 = vector.shape_cast %41 : vector<1x3x64xf32> to vector<3x64xf32>
      %cst_27 = arith.constant dense<0.000000e+00> : vector<16x64xf32>
      %43 = tpu.matmul %36, %39, %cst_27 {dimension_numbers = #tpu.dot_dimension_numbers<[1], [0], [0], [1], [0, 0, 1, 1], [], []>} : vector<16x64xf32>, vector<64x64xf32>, vector<16x64xf32> -> vector<16x64xf32>
      %44 = vector.extract_strided_slice %42 {offsets = [0, 0], sizes = [1, 64], strides = [1, 1]} : vector<3x64xf32> to vector<1x64xf32>
      %45 = vector.broadcast %44 : vector<1x64xf32> to vector<16x64xf32>
      %46 = arith.addf %43, %45 : vector<16x64xf32>
      %cst_28 = arith.constant 0.000000e+00 : f32
      %47 = vector.broadcast %cst_28 : f32 to vector<16x64xf32>
      %48 = arith.maximumf %46, %47 : vector<16x64xf32>
      %c0_29 = arith.constant 0 : index
      %c0_30 = arith.constant 0 : index
      %c0_31 = arith.constant 0 : index
      %49 = vector.load %arg4[%c0_29, %c0_30, %c0_31] : memref<1x16x1xf32, #tpu.memory_space<vmem>>, vector<1x16x1xf32>
      %50 = vector.shape_cast %49 : vector<1x16x1xf32> to vector<16x1xf32>
      %51 = vector.broadcast %50 : vector<16x1xf32> to vector<16x64xf32>
      %52 = arith.mulf %48, %51 : vector<16x64xf32>
      %53 = arith.index_cast %arg1 : i32 to index
      %c0_32 = arith.constant 0 : index
      %c0_33 = arith.constant 0 : index
      %54 = vector.load %arg11[%53, %c0_32, %c0_33] : memref<1x16x64xf32, #tpu.memory_space<vmem>>, vector<1x16x64xf32>
      %55 = vector.shape_cast %54 : vector<1x16x64xf32> to vector<16x64xf32>
      %56 = vector.shape_cast %52 : vector<16x64xf32> to vector<1x16x64xf32>
      tpu.vector_store %arg11[%53, %c0_32, %c0_33], %56 {strides = array<i32>} : memref<1x16x64xf32, #tpu.memory_space<vmem>>, vector<1x16x64xf32>,
      %c0_34 = arith.constant 0 : index
      %c0_35 = arith.constant 0 : index
      %57 = vector.load %arg12[%c0_34, %c0_35] : memref<1x64xf32, #tpu.memory_space<vmem>>, vector<1x64xf32>
      %cst_36 = arith.constant dense<0.000000e+00> : vector<64xf32>
      %58 = vector.multi_reduction <add>, %52, %cst_36 [0] : vector<16x64xf32> to vector<64xf32>
      %59 = vector.shape_cast %58 : vector<64xf32> to vector<1x64xf32>
      %60 = arith.addf %57, %59 : vector<1x64xf32>
      %c0_37 = arith.constant 0 : index
      %c0_38 = arith.constant 0 : index
      %61 = vector.load %arg12[%c0_37, %c0_38] : memref<1x64xf32, #tpu.memory_space<vmem>>, vector<1x64xf32>
      tpu.vector_store %arg12[%c0_37, %c0_38], %60 {strides = array<i32>} : memref<1x64xf32, #tpu.memory_space<vmem>>, vector<1x64xf32>,
      %c0_39 = arith.constant 0 : index
      %c0_40 = arith.constant 0 : index
      %62 = vector.load %arg13[%c0_39, %c0_40] : memref<1x64xf32, #tpu.memory_space<vmem>>, vector<1x64xf32>
      %63 = arith.mulf %52, %52 : vector<16x64xf32>
      %cst_41 = arith.constant dense<0.000000e+00> : vector<64xf32>
      %64 = vector.multi_reduction <add>, %63, %cst_41 [0] : vector<16x64xf32> to vector<64xf32>
      %65 = vector.shape_cast %64 : vector<64xf32> to vector<1x64xf32>
      %66 = arith.addf %62, %65 : vector<1x64xf32>
      %c0_42 = arith.constant 0 : index
      %c0_43 = arith.constant 0 : index
      %67 = vector.load %arg13[%c0_42, %c0_43] : memref<1x64xf32, #tpu.memory_space<vmem>>, vector<1x64xf32>
      tpu.vector_store %arg13[%c0_42, %c0_43], %66 {strides = array<i32>} : memref<1x64xf32, #tpu.memory_space<vmem>>, vector<1x64xf32>,
      %c0_i32_44 = arith.constant 0 : i32
      %68 = arith.cmpi eq, %arg1, %c0_i32_44 : i32
      %69 = arith.extui %68 : i1 to i32
      %c0_i32_45 = arith.constant 0 : i32
      %70 = arith.cmpi ne, %69, %c0_i32_45 : i32
      scf.if %70 {
        %c0_46 = arith.constant 0 : index
        %c0_47 = arith.constant 0 : index
        %71 = vector.load %arg12[%c0_46, %c0_47] : memref<1x64xf32, #tpu.memory_space<vmem>>, vector<1x64xf32>
        %72 = vector.broadcast %cst : f32 to vector<1x64xf32>
        %73 = arith.mulf %71, %72 : vector<1x64xf32>
        %c0_48 = arith.constant 0 : index
        %c0_49 = arith.constant 0 : index
        %74 = vector.load %arg13[%c0_48, %c0_49] : memref<1x64xf32, #tpu.memory_space<vmem>>, vector<1x64xf32>
        %75 = vector.broadcast %cst : f32 to vector<1x64xf32>
        %76 = arith.mulf %74, %75 : vector<1x64xf32>
        %77 = arith.mulf %73, %73 : vector<1x64xf32>
        %78 = arith.subf %76, %77 : vector<1x64xf32>
        %79 = vector.extract_strided_slice %42 {offsets = [1, 0], sizes = [1, 64], strides = [1, 1]} : vector<3x64xf32> to vector<1x64xf32>
        %cst_50 = arith.constant 9.99999974E-6 : f32
        %80 = vector.broadcast %cst_50 : f32 to vector<1x64xf32>
        %81 = arith.addf %78, %80 : vector<1x64xf32>
        %82 = math.rsqrt %81 : vector<1x64xf32>
        %83 = arith.mulf %79, %82 : vector<1x64xf32>
        %c0_51 = arith.constant 0 : index
        %c0_52 = arith.constant 0 : index
        %84 = vector.load %arg14[%c0_51, %c0_52] : memref<1x64xf32, #tpu.memory_space<vmem>>, vector<1x64xf32>
        tpu.vector_store %arg14[%c0_51, %c0_52], %83 {strides = array<i32>} : memref<1x64xf32, #tpu.memory_space<vmem>>, vector<1x64xf32>,
        %85 = vector.extract_strided_slice %42 {offsets = [2, 0], sizes = [1, 64], strides = [1, 1]} : vector<3x64xf32> to vector<1x64xf32>
        %86 = arith.mulf %73, %83 : vector<1x64xf32>
        %87 = arith.subf %85, %86 : vector<1x64xf32>
        %c0_53 = arith.constant 0 : index
        %c0_54 = arith.constant 0 : index
        %88 = vector.load %arg15[%c0_53, %c0_54] : memref<1x64xf32, #tpu.memory_space<vmem>>, vector<1x64xf32>
        tpu.vector_store %arg15[%c0_53, %c0_54], %87 {strides = array<i32>} : memref<1x64xf32, #tpu.memory_space<vmem>>, vector<1x64xf32>,
      } else {
      }
    } else {
    }
    %c3_i32_3 = arith.constant 3 : i32
    %8 = arith.cmpi eq, %arg0, %c3_i32_3 : i32
    %9 = arith.extui %8 : i1 to i32
    %c0_i32_4 = arith.constant 0 : i32
    %10 = arith.cmpi ne, %9, %c0_i32_4 : i32
    scf.if %10 {
      %11 = arith.index_cast %arg1 : i32 to index
      %c0 = arith.constant 0 : index
      %c0_5 = arith.constant 0 : index
      %12 = vector.load %arg11[%11, %c0, %c0_5] : memref<1x16x64xf32, #tpu.memory_space<vmem>>, vector<1x16x64xf32>
      %13 = vector.shape_cast %12 : vector<1x16x64xf32> to vector<16x64xf32>
      %c0_6 = arith.constant 0 : index
      %c0_7 = arith.constant 0 : index
      %14 = vector.load %arg14[%c0_6, %c0_7] : memref<1x64xf32, #tpu.memory_space<vmem>>, vector<1x64xf32>
      %15 = vector.broadcast %14 : vector<1x64xf32> to vector<16x64xf32>
      %16 = arith.mulf %13, %15 : vector<16x64xf32>
      %c0_8 = arith.constant 0 : index
      %c0_9 = arith.constant 0 : index
      %17 = vector.load %arg15[%c0_8, %c0_9] : memref<1x64xf32, #tpu.memory_space<vmem>>, vector<1x64xf32>
      %18 = vector.broadcast %17 : vector<1x64xf32> to vector<16x64xf32>
      %19 = arith.addf %16, %18 : vector<16x64xf32>
      %20 = vector.shape_cast %19 : vector<16x64xf32> to vector<2x8x64xf32>
      %cst_10 = arith.constant dense<0.000000e+00> : vector<2x64xf32>
      %21 = vector.multi_reduction <add>, %20, %cst_10 [1] : vector<2x8x64xf32> to vector<2x64xf32>
      %cst_11 = arith.constant 1.250000e-01 : f32
      %22 = vector.broadcast %cst_11 : f32 to vector<2x64xf32>
      %23 = arith.mulf %21, %22 : vector<2x64xf32>
      %c0_12 = arith.constant 0 : index
      %c0_13 = arith.constant 0 : index
      %24 = vector.load %arg8[%c0_12, %c0_13] : memref<64x128xf32, #tpu.memory_space<vmem>>, vector<64x128xf32>
      %cst_14 = arith.constant dense<0.000000e+00> : vector<2x128xf32>
      %25 = tpu.matmul %23, %24, %cst_14 {dimension_numbers = #tpu.dot_dimension_numbers<[1], [0], [0], [1], [0, 0, 1, 1], [], []>} : vector<2x64xf32>, vector<64x128xf32>, vector<2x128xf32> -> vector<2x128xf32>
      %c0_15 = arith.constant 0 : index
      %c0_16 = arith.constant 0 : index
      %26 = vector.load %arg9[%c0_15, %c0_16] : memref<1x128xf32, #tpu.memory_space<vmem>>, vector<1x128xf32>
      %27 = vector.broadcast %26 : vector<1x128xf32> to vector<2x128xf32>
      %28 = arith.addf %25, %27 : vector<2x128xf32>
      %c0_17 = arith.constant 0 : index
      %c0_18 = arith.constant 0 : index
      %29 = vector.load %arg10[%c0_17, %c0_18] : memref<2x128xf32, #tpu.memory_space<vmem>>, vector<2x128xf32>
      tpu.vector_store %arg10[%c0_17, %c0_18], %28 {strides = array<i32>} : memref<2x128xf32, #tpu.memory_space<vmem>>, vector<2x128xf32>,
    } else {
    }
    return
  }
  func.func @transform_0(%arg0: i32, %arg1: i32) -> (i32, i32, i32) {
    %c0_i32 = arith.constant 0 : i32
    %c0_i32_0 = arith.constant 0 : i32
    %c0_i32_1 = arith.constant 0 : i32
    return %arg1, %c0_i32, %c0_i32_0 : i32, i32, i32
  }
  func.func @transform_1(%arg0: i32, %arg1: i32) -> (i32, i32, i32) {
    %c0_i32 = arith.constant 0 : i32
    %c0_i32_0 = arith.constant 0 : i32
    %c0_i32_1 = arith.constant 0 : i32
    return %arg1, %c0_i32, %c0_i32_0 : i32, i32, i32
  }
  func.func @transform_2(%arg0: i32, %arg1: i32) -> (i32, i32, i32) {
    %c0_i32 = arith.constant 0 : i32
    %c0_i32_0 = arith.constant 0 : i32
    %c0_i32_1 = arith.constant 0 : i32
    return %arg1, %c0_i32, %c0_i32_0 : i32, i32, i32
  }
  func.func @transform_3(%arg0: i32, %arg1: i32) -> (i32, i32) {
    %c0_i32 = arith.constant 0 : i32
    %c0_i32_0 = arith.constant 0 : i32
    %c0_i32_1 = arith.constant 0 : i32
    return %c0_i32, %c0_i32_0 : i32, i32
  }
  func.func @transform_4(%arg0: i32, %arg1: i32) -> (i32, i32, i32) {
    %c0_i32 = arith.constant 0 : i32
    %c0_i32_0 = arith.constant 0 : i32
    %c0_i32_1 = arith.constant 0 : i32
    %c0_i32_2 = arith.constant 0 : i32
    return %c0_i32, %c0_i32_0, %c0_i32_1 : i32, i32, i32
  }
  func.func @transform_5(%arg0: i32, %arg1: i32) -> (i32, i32, i32) {
    %c0_i32 = arith.constant 0 : i32
    %c0_i32_0 = arith.constant 0 : i32
    %c0_i32_1 = arith.constant 0 : i32
    %c0_i32_2 = arith.constant 0 : i32
    return %c0_i32, %c0_i32_0, %c0_i32_1 : i32, i32, i32
  }
  func.func @transform_6(%arg0: i32, %arg1: i32) -> (i32, i32) {
    %c0_i32 = arith.constant 0 : i32
    %c0_i32_0 = arith.constant 0 : i32
    %c0_i32_1 = arith.constant 0 : i32
    return %c0_i32, %c0_i32_0 : i32, i32
  }
  func.func @transform_7(%arg0: i32, %arg1: i32) -> (i32, i32) {
    %c0_i32 = arith.constant 0 : i32
    %c0_i32_0 = arith.constant 0 : i32
    %c0_i32_1 = arith.constant 0 : i32
    return %c0_i32, %c0_i32_0 : i32, i32
  }
  func.func @transform_8(%arg0: i32, %arg1: i32) -> (i32, i32) {
    %c3_i32 = arith.constant 3 : i32
    %0 = arith.cmpi eq, %arg0, %c3_i32 : i32
    %c0_i32 = arith.constant 0 : i32
    %1 = arith.select %0, %arg1, %c0_i32 : i32
    %c0_i32_0 = arith.constant 0 : i32
    %c0_i32_1 = arith.constant 0 : i32
    return %1, %c0_i32_0 : i32, i32
  }
}

</mosaic_0001>

<bundles_post_ra>
// kernel: tpu_custom_call.1
= control target key start
LH: loop header
LB: loop body
LE: loop exit
PB: predicated region body
PF: predicated region fallthrough
CT: control target
= control target key end

     0   :  { %13 = vsyncpa [#allocation8], 0  ;;  %s1711_s0 = inlined_call_operand.vmem [shape: s32[1,16,1], index: 0, kind: input, shape index: {}]   ;;  %s1712_s1 = inlined_call_operand.vmem [shape: f32[1,16,16], index: 1, kind: input, shape index: {}]   ;;  %s1713_s2 = inlined_call_operand.vmem [shape: f32[1,16,1], index: 2, kind: input, shape index: {}]   ;;  %s1714_s3 = inlined_call_operand.vmem [shape: f32[128,64], index: 3, kind: input, shape index: {}]   ;;  %s1715_s4 = inlined_call_operand.vmem [shape: f32[3,64,64], index: 4, kind: input, shape index: {}]   ;;  %s1716_s5 = inlined_call_operand.vmem [shape: f32[3,3,64], index: 5, kind: input, shape index: {}]   ;;  %s1717_s6 = inlined_call_operand.hbm [shape: f32[64,128], index: 6, kind: input, shape index: {}]   ;;  %s1718_s7 = inlined_call_operand.vmem [shape: f32[1,128], index: 7, kind: input, shape index: {}]   ;;  %s1719_s8 = inlined_call_operand.hbm [shape: f32[2,128], index: 8, kind: output, shape index: {}]  }
   0x1   :  { %14 = vsyncpa [#allocation9], 0 }
   0x2   :  { %16 = vsyncpa [#allocation9 + $0x1], 0  ;;  %s1500_s27 = smov 0   ;;  %s1502_s28 = smov 0  }
   0x3   :  { %s1504_s29 = smov 0  }
   0x4 LB: > { %s1076_s30 = sadd.s32 4294967295, %s1440_s29   ;;  %s1077_s9 = sadd.s32 4294967294, %s1440_s29   ;;  %s1440_s29 = sphi %s1504_s29, %s22_s29   ;;  %s1436_s28 = sphi %s1502_s28, %s1730_s28   ;;  %s1432_s27 = sphi %s1500_s27, %s1729_s27  }
   0x5   : > { %s34_s10 = sadd.s32 1, %s1436_s28  ;;  %p1078_p0 = scmp.ge.s32.totalorder %s1440_s29, 1 }
   0x6   : > { %p36_p1 = scmp.ge.s32.totalorder %s34_s10, 4  ;;  %p252_p2 = scmp.lt.s32.totalorder %s1440_s29, 5 }
   0x7   : > { %p1522_p3 = scmp.eq.s32.totalorder %s1076_s30, 0  ;;  %s1442_s13 = smov [#allocation7]  }
   0x8   : > { %s1732_s10 = smov (%p36_p1, %s34_s10), 0  ;;  %p1528_p4 = pnand %p1078_p0, %p252_p2 }
   0x9   : > { %s1723_s11 = scalar_select %p1522_p3, 1, 0 }
   0xa   : > { %s1724_s12 = scalar_select %p1528_p4, 1, 0 }
   0xb   : > { %s297_s14 = sshll.u32 %s1442_s13, 4  ;;  %p1302_p5 = pneg %p1528_p4  ;;  %s298_s14 = int_to_ptr.vmem [resolvable:$true] %s297_s14 }
   0xc   : > { %s1356_s18 = scalar_lea.hbm %s1717_s6, 1024 }
   0xd   : > { %p1536_p6 = pnand %p1522_p3, %p1302_p5  ;;  %p1357_p7 = scmp.ne.s32.totalorder %s1717_s6, %s1356_s18 }
   0xe   : > { %p1363_p11 = scmp.lt.u32.totalorder %s1356_s18, %s1717_s6 }
   0xf   : > { %p1358_p8 = pneg %p1536_p6 }
  0x11   : > { %p1359_p9 = pnand %p1358_p8, %p1357_p7 }
  0x13   : > { %p1360_p10 = pneg %p1359_p9 }
  0x15   : > { %p1365_p12 = pnand %p1363_p11, %p1360_p10 }
  0x17   : > { %1368 = shalt.err (!%p1365_p12)
}
  0x18   : > { %s1369_s23 = scalar_lea.vmem %s298_s14, 1024  ;;  %p1377_p2 = scmp.lt.s32.totalorder %s298_s14, %s298_s14 }
  0x19   : > { %p1370_p13 = scmp.ne.s32.totalorder %s298_s14, %s1369_s23  ;;  %p1378_p5 = scmp.lt.s32.totalorder %s1369_s23, %s1369_s23 }
  0x1b   : > { %p1372_p0 = pnand %p1370_p13, %p1358_p8  ;;  %p1379_p3 = por %p1378_p5, %p1377_p2 }
  0x1d   : > { %p1373_p1 = pneg %p1372_p0 }
  0x1f   : > { %p1380_p4 = pnand %p1379_p3, %p1373_p1 }
  0x21   : > { %1383 = shalt.err (!%p1380_p4)
}
  0x22   : > { %s1443_s24 = smov 128   ;;  %s1444_s25 = smov 8  }
  0x23   : > { %1305 = dma.hbm_to_vmem [thread:$0]  (!%p1536_p6), %s1717_s6, 1024, %s298_s14, [#allocation8], %s1443_s24, %s1443_s24, %s1444_s25  }
  0x24   : > { %p1726_p7 = scmp.ne.s32.totalorder %s1724_s12, 0 }
  0x25   : > { %p1727_p9 = scmp.ne.s32.totalorder (!%p1726_p7), %s1723_s11, 0 }
  0x26   : > { %316 = sbr.rel (%p1726_p7) target bundleno = 1168 (0x490), region = 52 }
  0x2d   : > { %1423 = dma.done.wait (%p1727_p9), [#allocation8], 1024  }
  0x2e   : > { %1425 = vsyncadd (%p1727_p9), [#allocation8], 4294966272  ;;  %p377_p3 = scmp.eq.s32.totalorder %s1432_s27, 0 }
  0x2f   : > { %vm383_vm0 = vcmask (%p377_p3), 516096   ;;  %v1445_v0 = vmov (%p377_p3), 1.0   ;;  %v1446_v1 = vmov (%p377_p3), 0.0  }
  0x30   : > { %382 = sbr.rel (!%p377_p3) target bundleno = 55 (0x37), region = 60  ;;  %384 = vst.msk [vmem:[#allocation5] sm:$0x1] (%p377_p3), %vm383_vm0, %v1445_v0  ;;  %385 = vst.msk [vmem:[#allocation6] sm:$0x1] (%p377_p3), %vm383_vm0, %v1446_v1 }
  0x37 PF: > { %p1086_p4 = scmp.ge.s32.totalorder %s1432_s27, 3 }
  0x38   : > { %v396_v2 = vld [vmem:[%s1711_s0] sm:$0xff] (!%p1086_p4)  ;;  %v1447_v4 = vmov (!%p1086_p4), 0   ;;  %v413_v5 = vld [vmem:[%s1714_s3 + $0x8] sm:$0xff] (!%p1086_p4)  ;;  %v414_v6 = vld [vmem:[%s1714_s3 + $0x10] sm:$0xff] (!%p1086_p4)  ;;  %v398_v29 = vlaneseq (!%p1086_p4)  ;;  %v1448_v32 = vmov (!%p1086_p4), 1.0   ;;  %vm532_vm3 = vcmask (!%p1086_p4), 130048  }
  0x39   : > { %389 = sbr.rel (%p1086_p4) target bundleno = 905 (0x389), region = 64  ;;  %v412_v3 = vld [vmem:[%s1714_s3] sm:$0xff] (!%p1086_p4)  ;;  %1352 = vset.pattern.permute.xlu0 (!%p1086_p4), %v1447_v4  ;;  %v415_v7 = vld [vmem:[%s1714_s3 + $0x18] sm:$0xff] (!%p1086_p4)  ;;  %1353 = vset.pattern.permute.xlu1 (!%p1086_p4), %v1447_v4  ;;  %v397_v10 = vld [vmem:[%s1711_s0 + $0x8] sm:$0xff] (!%p1086_p4)  ;;  %s1095_s19 = sshll.u32 (!%p1086_p4), %s1432_s27, 6  ;;  %vm631_vm5 = vcmask (!%p1086_p4), 523264  }
  0x3a   : > { %401 = vperm.xlu0 (!%p1086_p4), %1352, %v396_v2   ;;  %v1230_v8 = vpack.c.bf16 (!%p1086_p4), %v413_v5, %v412_v3  ;;  %v1234_v9 = vpack.c.bf16 (!%p1086_p4), %v415_v7, %v414_v6  ;;  %v416_v11 = vld [vmem:[%s1714_s3 + $0x20] sm:$0xff] (!%p1086_p4)  ;;  %v417_v12 = vld [vmem:[%s1714_s3 + $0x28] sm:$0xff] (!%p1086_p4)  ;;  %v418_v14 = vld [vmem:[%s1714_s3 + $0x30] sm:$0xff] (!%p1086_p4)  ;;  %v399_v30 = vand.u32 (!%p1086_p4), 127, %v398_v29  ;;  %s615_s22 = scalar_lea.vmem (!%p1086_p4), %s1715_s4, %s1095_s19  ;;  %vm393_vm6 = vcmask (!%p1086_p4), 516096   ;;  %s1096_s14 = sshll.u32 (!%p1086_p4), %s1432_s27, 2 }
  0x3b   : > { %v1238_v13 = vpack.c.bf16 (!%p1086_p4), %v417_v12, %v416_v11  ;;  %v419_v15 = vld [vmem:[%s1714_s3 + $0x38] sm:$0xff] (!%p1086_p4)  ;;  %v420_v17 = vld [vmem:[%s1714_s3 + $0x40] sm:$0xff] (!%p1086_p4)  ;;  %v421_v18 = vld [vmem:[%s1714_s3 + $0x48] sm:$0xff] (!%p1086_p4)  ;;  %v1449_v2 = vmov (!%p1086_p4), 0.0   ;;  %v628_v3 = vshrl.u32 (!%p1086_p4), %v398_v29, 7  ;;  %s625_s16 = scalar_lea.vmem (!%p1086_p4), %s1716_s5, %s1096_s14  ;;  %vm776_vm7 = vcmask (!%p1086_p4), 517121  }
  0x3c   : > { %1231 = vmatprep.subr.bf16.mxu0 (!%p1086_p4), %v1230_v8  ;;  %v1242_v16 = vpack.c.bf16 (!%p1086_p4), %v419_v15, %v418_v14  ;;  %v1246_v19 = vpack.c.bf16 (!%p1086_p4), %v421_v18, %v420_v17  ;;  %v422_v20 = vld [vmem:[%s1714_s3 + $0x50] sm:$0xff] (!%p1086_p4)  ;;  %v423_v21 = vld [vmem:[%s1714_s3 + $0x58] sm:$0xff] (!%p1086_p4)  ;;  %v424_v23 = vld [vmem:[%s1714_s3 + $0x60] sm:$0xff] (!%p1086_p4)  ;;  %394 = vst.msk [vmem:[#allocation3] sm:$0x1] (!%p1086_p4), %vm393_vm6, %v1449_v2  ;;  %vm803_vm8 = vcmask (!%p1086_p4), 518146  }
  0x3d   : > { %1233 = vmatpush3.bf16.msra.mxu0 (!%p1086_p4), %v1230_v8  ;;  %v1250_v22 = vpack.c.bf16 (!%p1086_p4), %v423_v21, %v422_v20  ;;  %v425_v24 = vld [vmem:[%s1714_s3 + $0x68] sm:$0xff] (!%p1086_p4)  ;;  %v426_v26 = vld [vmem:[%s1714_s3 + $0x70] sm:$0xff] (!%p1086_p4)  ;;  %v427_v27 = vld [vmem:[%s1714_s3 + $0x78] sm:$0xff] (!%p1086_p4)  ;;  %395 = vst.msk [vmem:[#allocation4] sm:$0x1] (!%p1086_p4), %vm393_vm6, %v1449_v2  ;;  %v1650_v4 = vsub.s32 (!%p1086_p4), 0, %v628_v3 }
  0x3e   : > { %404 = vperm.xlu0 (!%p1086_p4), %1352, %v397_v10   ;;  %1235 = vmatprep.subr.bf16.mxu0 (!%p1086_p4), %v1234_v9  ;;  %v1254_v25 = vpack.c.bf16 (!%p1086_p4), %v425_v24, %v424_v23  ;;  %v1258_v28 = vpack.c.bf16 (!%p1086_p4), %v427_v27, %v426_v26  ;;  %v530_v34 = vld [vmem:[%s1712_s1] sm:$0xff] (!%p1086_p4)  ;;  %v506_v35 = vld [vmem:[#allocation2 + $0x8] sm:$0xff] (!%p1086_p4)  ;;  %v505_v37 = vld [vmem:[#allocation2] sm:$0xff] (!%p1086_p4) }
  0x3f   : > { %1189 = vmatprep.mubr.msk.f32.mxu1 (!%p1086_p4), %vm532_vm3, %v530_v34  ;;  %v1091_v36 = vld [vmem:[#allocation5] ss:$0 sm:$0xff] (!%p1086_p4)  ;;  %v1092_v39 = vld [vmem:[#allocation6] ss:$0 sm:$0xff] (!%p1086_p4)  ;;  %v617_v46 = vld [vmem:[%s615_s22 + $0x8] sm:$0xff] (!%p1086_p4) }
  0x40   : > { %s525_s18 = scalar_select %p377_p3, 1, 0  ;;  %v515_v38 = vmul.f32 %v1091_v36, %v506_v35  ;;  %v514_v40 = vmul.f32 %v1091_v36, %v505_v37  ;;  %v616_v45 = vld [vmem:[%s615_s22] sm:$0xff]  ;;  %v618_v52 = vld [vmem:[%s615_s22 + $0x10] sm:$0xff]  ;;  %v619_v53 = vld [vmem:[%s615_s22 + $0x18] sm:$0xff] }
  0x41   : > { %1237 = vmatpush3.bf16.msra.mxu0 %v1234_v9  ;;  %v1266_v51 = vpack.c.bf16 %v617_v46, %v616_v45  ;;  %v531_v54 = vld [vmem:[%s1712_s1 + $0x8] sm:$0xff]  ;;  %v1270_v55 = vpack.c.bf16 %v619_v53, %v618_v52  ;;  %v620_v56 = vld [vmem:[%s615_s22 + $0x20] sm:$0xff]  ;;  %v622_v59 = vld [vmem:[%s615_s22 + $0x30] sm:$0xff] }
  0x42   : > { %1239 = vmatprep.subr.bf16.mxu0 %v1238_v13  ;;  %v526_v41 = vstv %s525_s18  ;;  %v524_v42 = vadd.f32 %v1092_v39, %v515_v38  ;;  %v523_v43 = vadd.f32 %v1092_v39, %v514_v40  ;;  %v621_v57 = vld [vmem:[%s615_s22 + $0x28] sm:$0xff]  ;;  %v623_v60 = vld [vmem:[%s615_s22 + $0x38] sm:$0xff]  ;;  %v715_v62 = vld [vmem:[%s1713_s2] sm:$0xff] }
  0x43   : > { %vm527_vm4 = vcmp.eq.s32.totalorder %v526_v41, 1  ;;  %v1274_v58 = vpack.c.bf16 %v621_v57, %v620_v56  ;;  %v1278_v61 = vpack.c.bf16 %v623_v60, %v622_v59  ;;  %719 = vperm.xlu1 %1353, %v715_v62   ;;  %v716_v63 = vld [vmem:[%s1713_s2 + $0x8] sm:$0xff]  ;;  %v1652_v5 = vld [vmem:[%s625_s16] sm:$0x7] }
  0x44   : > { %v630_v6 = vrot.slane %v1652_v5, %v1650_v4  ;;  %v731_v34 = vld [vmem:[#allocation3] sm:$0x1]  ;;  %v744_v37 = vld [vmem:[#allocation4] sm:$0x1] }
  0x45   : > { %1241 = vmatpush3.bf16.msra.mxu0 %v1238_v13 }
  0x46   : > { %1243 = vmatprep.subr.bf16.mxu0 %v1242_v16 }
  0x47   : > { %724 = vperm.xlu1 %1353, %v716_v63  }
  0x49   : > { %1245 = vmatpush3.bf16.msra.mxu0 %v1242_v16 }
  0x4a   : > { %1247 = vmatprep.subr.bf16.mxu0 %v1246_v19 }
  0x4d   : > { %1249 = vmatpush3.bf16.msra.mxu0 %v1246_v19 }
  0x4e   : > { %1251 = vmatprep.subr.bf16.mxu0 %v1250_v22 }
  0x51   : > { %1253 = vmatpush3.bf16.msra.mxu0 %v1250_v22 }
  0x52   : > { %1255 = vmatprep.subr.bf16.mxu0 %v1254_v25 }
  0x55   : > { %1257 = vmatpush3.bf16.msra.mxu0 %v1254_v25 }
  0x56   : > { %1259 = vmatprep.subr.bf16.mxu0 %v1258_v28 }
  0x59   : > { %1261 = vmatpush3.bf16.msra.mxu0 %v1258_v28 }
  0xb9   : > { %v402_v31 = vpop.permute.xlu0 %401 }
  0xba   : > { %vm406_vm1 = vcmp.eq.s32.totalorder %v399_v30, %v402_v31 }
  0xbb   : > { %1182 = vmatprep.mubr.msk.f32.mxu0 %vm406_vm1, %v1448_v32 }
  0xbd   : > { %v405_v33 = vpop.permute.xlu0 %404 }
  0xbe   : > { %vm407_vm2 = vcmp.eq.s32.totalorder %v399_v30, %v405_v33 }
  0xbf   : > { %1183 = vmatmul.mubr.msk.f32.vlgmr.msra.gmra.mrb[0].mxu0 %vm407_vm2, %v1448_v32 }
  0xc2   : > { %v720_v7 = vpop.permute.xlu1 %719 }
  0xc6   : > { %v725_v13 = vpop.permute.xlu1 %724 }
 0x192   : > { %v1184_v44 = vpop.f32.mrb[0].mxu0 }
 0x193   : > { %v529_v47 = vsel %vm527_vm4, %v1184_v44, %v524_v42  ;;  %v494_v48 = vpop.f32.mrb[1].mxu0 }
 0x194   : > { %v528_v49 = vsel %vm527_vm4, %v494_v48, %v523_v43  ;;  %v1450_v48 = vmov 1966171168  }
 0x195   : > { %v1262_v50 = vpack.c.bf16 %v529_v47, %v528_v49  ;;  %v780_v49 = vunpack.c.l.s4 %v1450_v48 }
 0x197   : > { %1263 = vmatprep.subr.bf16.mxu1 %v1262_v50 }
 0x198   : > { %1265 = vmatpush3.bf16.msra.mxu1 %v1262_v50  ;;  %v781_v50 = vunpack.c.0.s8 %v780_v49 }
 0x199   : > { %1267 = vmatprep.subr.bf16.mxu1 %v1266_v51 }
 0x19a   : > { %v784_v52 = vsub.s32 %v781_v50, %v628_v3 }
 0x19b   : > { %1190 = vmatmul.mubr.msk.f32.vlgmr.msra.gmra.mrb[0].mxu1 %vm532_vm3, %v531_v54 }
 0x19c   : > { %1269 = vmatpush3.bf16.msra.mxu1 %v1266_v51 }
 0x19d   : > { %1271 = vmatprep.subr.bf16.mxu1 %v1270_v55 }
 0x1a0   : > { %1273 = vmatpush3.bf16.msra.mxu1 %v1270_v55 }
 0x1a1   : > { %1275 = vmatprep.subr.bf16.mxu1 %v1274_v58 }
 0x1a4   : > { %1277 = vmatpush3.bf16.msra.mxu1 %v1274_v58 }
 0x1a5   : > { %1279 = vmatprep.subr.bf16.mxu1 %v1278_v61 }
 0x1a8   : > { %1281 = vmatpush3.bf16.msra.mxu1 %v1278_v61 }
 0x26e   : > { %v1191_v0 = vpop.f32.mrb[0].mxu1 }
 0x26f   : > { %v605_v1 = vpop.f32.mrb[1].mxu1 }
 0x270   : > { %1208 = vmatprep.mubr.msk.f32.mxu1 %vm631_vm5, %v605_v1 }
 0x271   : > { %1209 = vmatmul.mubr.msk.f32.vlgmr.msra.gmra.mrb[2].mxu1 %vm631_vm5, %v1191_v0 }
 0x344   : > { %v1210_v8 = vpop.f32.mrb[2].mxu1 }
 0x345   : > { %v710_v9 = vadd.f32 %v1210_v8, %v630_v6  ;;  %v704_v10 = vpop.f32.mrb[3].mxu1 }
 0x346   : > { %v705_v11 = vadd.f32 %v704_v10, %v630_v6 }
 0x347   : > { %v714_v12 = vmax.f32 %v710_v9, 0.0 }
 0x348   : > { %v713_v14 = vmax.f32 %v705_v11, 0.0 }
 0x349   : > { %v728_v15 = vmul.f32 %v725_v13, %v714_v12 }
 0x34a   : > { %v727_v16 = vmul.f32 %v720_v7, %v713_v14 }
 0x34b   : > { %730 = vst.msk [vmem:[#allocation2 + $0x8] sm:$0xff] %vm631_vm5, %v728_v15  ;;  %v733_v17 = vsel %vm631_vm5, %v728_v15, 0.0  ;;  %v746_v18 = vmul.f32 %v728_v15, %v728_v15 }
 0x34c   : > { %729 = vst.msk [vmem:[#allocation2] sm:$0xff] %vm631_vm5, %v727_v16  ;;  %v732_v19 = vsel %vm631_vm5, %v727_v16, 0.0  ;;  %v745_v20 = vmul.f32 %v727_v16, %v727_v16 }
 0x34d   : > { %v748_v21 = vsel %vm631_vm5, %v746_v18, 0.0  ;;  %v734_v22 = vadd.f32 %v733_v17, %v732_v19 }
 0x34e   : > { %v747_v23 = vsel %vm631_vm5, %v745_v20, 0.0 }
 0x34f   : > { %v735_v24 = vrot.slane %v734_v22, 4  ;;  %v749_v25 = vadd.f32 %v748_v21, %v747_v23 }
 0x351   : > { %v736_v26 = vadd.f32 %v735_v24, %v734_v22  ;;  %v750_v27 = vrot.slane %v749_v25, 4 }
 0x353   : > { %v737_v28 = vrot.slane %v736_v26, 2  ;;  %v751_v29 = vadd.f32 %v750_v27, %v749_v25 }
 0x355   : > { %v738_v30 = vadd.f32 %v737_v28, %v736_v26  ;;  %v752_v31 = vrot.slane %v751_v29, 2 }
 0x357   : > { %v739_v32 = vrot.slane %v738_v30, 1  ;;  %v753_v33 = vadd.f32 %v752_v31, %v751_v29 }
 0x359   : > { %v740_v35 = vadd.f32 %v739_v32, %v738_v30  ;;  %v754_v36 = vrot.slane %v753_v33, 1 }
 0x35b   : > { %v741_v38 = vadd.f32 %v740_v35, %v731_v34  ;;  %v755_v39 = vadd.f32 %v754_v36, %v753_v33 }
 0x35d   : > { %743 = vst.msk [vmem:[#allocation3] sm:$0x1] %vm393_vm6, %v741_v38  ;;  %v756_v40 = vadd.f32 %v755_v39, %v744_v37 }
 0x35f   : > { %757 = vst.msk [vmem:[#allocation4] sm:$0x1] %vm393_vm6, %v756_v40 }
 0x364   : > { %v761_v41 = vld [vmem:[#allocation3] sm:$0x1] }
 0x365   : > { %v762_v42 = vmul.f32 0.0625, %v761_v41 }
 0x366   : > { %v763_v43 = vld [vmem:[#allocation4] sm:$0x1] }
 0x367   : > { %v764_v44 = vmul.f32 0.0625, %v763_v43  ;;  %v765_v45 = vmul.f32 %v762_v42, %v762_v42 }
 0x369   : > { %v766_v46 = vsub.f32 %v764_v44, %v765_v45 }
 0x36b   : > { %v767_v47 = vadd.f32 1e-05, %v766_v46 }
 0x36d   : > { %1354 = vrsqrt.f32 %v767_v47 }
 0x377   : > { %v1355_v51 = vpop.eup %1354 }
 0x378   : > { %v773_v53 = vrot.slane %v1355_v51, %v1650_v4 }
 0x37a   : > { %v775_v54 = vmul.f32 %v773_v53, %v1652_v5 }
 0x37c   : > { %777 = vst.msk [vmem:[#allocation5 - $0x1] sm:$0x2] %vm776_vm7, %v775_v54  ;;  %v785_v55 = vrot.slane %v775_v54, %v784_v52 }
 0x37e   : > { %v786_v56 = vcombine.high %v785_v55, %v785_v55 }
 0x380   : > { %v793_v57 = vrot.slane %v786_v56, %v784_v52 }
 0x382   : > { %v795_v58 = vmul.f32 %v793_v57, %v762_v42 }
 0x384   : > { %v800_v59 = vrot.slane %v795_v58, %v1650_v4 }
 0x386   : > { %v802_v60 = vsub.f32 %v1652_v5, %v800_v59 }
 0x388   : > { %804 = vst.msk [vmem:[#allocation6 - $0x2] sm:$0x4] %vm803_vm8, %v802_v60 }
 0x389 PF: > { %p1099_p6 = scmp.ne.s32.totalorder %s1432_s27, 3 }
 0x38a   : > { %v848_v61 = vld [vmem:[#allocation7] sm:$0xff] (!%p1099_p6)  ;;  %v849_v62 = vld [vmem:[#allocation7 + $0x8] sm:$0xff] (!%p1099_p6)  ;;  %v850_v63 = vld [vmem:[#allocation7 + $0x10] sm:$0xff] (!%p1099_p6)  ;;  %v1451_v0 = vmov (!%p1099_p6), 0.0|0.0   ;;  %vm1452_vm9 = vmmov (!%p1099_p6), 0   ;;  %v1453_v3 = vmov (!%p1099_p6), 0.0  }
 0x38b   : > { %808 = sbr.rel (%p1099_p6) target bundleno = 1145 (0x479), region = 76  ;;  %1282 = vmatprep.subr.bf16.mxu0 (!%p1099_p6), %v1451_v0  ;;  %v1283_v1 = vpack.c.bf16 (!%p1099_p6), %v849_v62, %v848_v61  ;;  %v851_v2 = vld [vmem:[#allocation7 + $0x18] sm:$0xff] (!%p1099_p6)  ;;  %1227 = vmatprep.mubr.msk.f32.mxu0 (!%p1099_p6), %vm1452_vm9, %v1453_v3  ;;  %v811_v6 = vld [vmem:[#allocation2] sm:$0xff] (!%p1099_p6)  ;;  %v852_v9 = vld [vmem:[#allocation7 + $0x20] sm:$0xff] (!%p1099_p6)  ;;  %vm831_vm10 = vcmask (!%p1099_p6), 523264   ;;  %vm865_vm11 = vcmask (!%p1099_p6), 1041409  }
 0x38c   : > { %v1286_v4 = vpack.c.bf16 (!%p1099_p6), %v851_v2, %v850_v63  ;;  %v812_v7 = vld [vmem:[#allocation2 + $0x8] sm:$0xff] (!%p1099_p6)  ;;  %v1100_v5 = vld [vmem:[#allocation5] ss:$0 sm:$0xff] (!%p1099_p6)  ;;  %v853_v10 = vld [vmem:[#allocation7 + $0x28] sm:$0xff] (!%p1099_p6) }
 0x38d   : > { %1284 = vmatpush3.bf16.msra.mxu0 (!%p1099_p6), %v1283_v1  ;;  %v820_v11 = vmul.f32 (!%p1099_p6), %v1100_v5, %v811_v6  ;;  %v821_v12 = vmul.f32 (!%p1099_p6), %v1100_v5, %v812_v7  ;;  %v1289_v15 = vpack.c.bf16 (!%p1099_p6), %v853_v10, %v852_v9  ;;  %v854_v16 = vld [vmem:[#allocation7 + $0x30] sm:$0xff] (!%p1099_p6)  ;;  %v855_v17 = vld [vmem:[#allocation7 + $0x38] sm:$0xff] (!%p1099_p6) }
 0x38e   : > { %1285 = vmatprep.subr.bf16.mxu0 (!%p1099_p6), %v1451_v0  ;;  %v1292_v22 = vpack.c.bf16 (!%p1099_p6), %v855_v17, %v854_v16  ;;  %v1102_v36 = vld [vmem:[%s1718_s7] ss:$0 sm:$0xff] (!%p1099_p6) }
 0x38f   : > { %v1101_v8 = vld [vmem:[#allocation6] ss:$0 sm:$0xff] (!%p1099_p6) }
 0x390   : > { %v829_v13 = vadd.f32 (!%p1099_p6), %v1101_v8, %v820_v11  ;;  %v830_v14 = vadd.f32 (!%p1099_p6), %v1101_v8, %v821_v12 }
 0x391   : > { %1287 = vmatpush3.bf16.msra.mxu0 (!%p1099_p6), %v1286_v4 }
 0x392   : > { %1288 = vmatprep.subr.bf16.mxu0 %v1451_v0  ;;  %v832_v18 = vsel %vm831_vm10, %v829_v13, 0.0  ;;  %v839_v19 = vsel %vm831_vm10, %v830_v14, 0.0 }
 0x393   : > { %v833_v20 = vrot.slane %v832_v18, 4  ;;  %v840_v21 = vrot.slane %v839_v19, 4 }
 0x395   : > { %1290 = vmatpush3.bf16.msra.mxu0 %v1289_v15  ;;  %v834_v23 = vadd.f32 %v833_v20, %v832_v18  ;;  %v841_v24 = vadd.f32 %v840_v21, %v839_v19 }
 0x396   : > { %1291 = vmatprep.subr.bf16.mxu0 %v1451_v0 }
 0x397   : > { %v835_v25 = vrot.slane %v834_v23, 2  ;;  %v842_v26 = vrot.slane %v841_v24, 2 }
 0x399   : > { %1293 = vmatpush3.bf16.msra.mxu0 %v1292_v22  ;;  %v836_v27 = vadd.f32 %v835_v25, %v834_v23  ;;  %v843_v28 = vadd.f32 %v842_v26, %v841_v24 }
 0x39b   : > { %v837_v29 = vrot.slane %v836_v27, 1  ;;  %v844_v30 = vrot.slane %v843_v28, 1 }
 0x39d   : > { %v838_v31 = vadd.f32 %v837_v29, %v836_v27  ;;  %v845_v32 = vadd.f32 %v844_v30, %v843_v28 }
 0x39f   : > { %v846_v33 = vmul.f32 0.125, %v838_v31  ;;  %v847_v34 = vmul.f32 0.125, %v845_v32 }
 0x3a1   : > { %v866_v35 = vsel %vm865_vm11, %v847_v34, %v846_v33 }
 0x3a2   : > { %1228 = vmatmul.mubr.msk.f32.vlgmr.msra.gmra.mrb[0].mxu0 %vm831_vm10, %v866_v35 }
 0x475   : > { %v935_v37 = vpop.f32.mrb[0].mxu0 }
 0x476   : > { %v936_v38 = vadd.f32 %v1102_v36, %v935_v37  ;;  %v1229_v39 = vpop.f32.mrb[1].mxu0 }
 0x478   : > { %939 = vst [vmem:[#allocation10] sm:$0x3] %v936_v38 }
 0x479 PF: > { %p1677_p8 = scmp.eq.s32.totalorder %s1076_s30, 3  ;;  %s1454_s19 = smov [#allocation10]  }
 0x47a   : > { %s956_s20 = sshll.u32 %s1454_s19, 4  ;;  %s957_s20 = int_to_ptr.vmem [resolvable:$true] %s956_s20 }
 0x47b   : > { %s1384_s21 = scalar_lea.vmem %s957_s20, 32  ;;  %s1390_s22 = scalar_lea.vmem %s957_s20, 64 }
 0x47c   : > { %p1385_p10 = scmp.ne.s32.totalorder %s957_s20, %s1384_s21  ;;  %p1391_p13 = scmp.lt.s32.totalorder %s957_s20, %s957_s20 }
 0x47d   : > { %p1392_p0 = scmp.lt.s32.totalorder %s1390_s22, %s1384_s21 }
 0x47e   : > { %p1386_p11 = pnand %p1385_p10, %p1677_p8 }
 0x47f   : > { %p1393_p1 = por %p1392_p0, %p1391_p13 }
 0x480   : > { %p1387_p12 = pneg %p1386_p11 }
 0x482   : > { %p1394_p2 = pnand %p1393_p1, %p1387_p12 }
 0x484   : > { %1397 = shalt.err (!%p1394_p2)
}
 0x485   : > { %s1398_s24 = scalar_lea.hbm %s1719_s8, 32 }
 0x486   : > { %p1399_p5 = scmp.ne.s32.totalorder %s1719_s8, %s1398_s24  ;;  %p1404_p3 = scmp.lt.u32.totalorder %s1398_s24, %s1719_s8 }
 0x488   : > { %p1400_p7 = pnand %p1399_p5, %p1677_p8 }
 0x48a   : > { %p1401_p9 = pneg %p1400_p7 }
 0x48c   : > { %p1406_p4 = pnand %p1404_p3, %p1401_p9 }
 0x48e   : > { %1409 = shalt.err (!%p1406_p4)
}
 0x48f   : > { %1299 = dma.vmem_to_hbm [thread:$0]  (%p1677_p8), %s957_s20, 32, %s1719_s8, [#allocation9]  }
 0x490 PF: > { %p1313_p6 = scmp.ge.s32.totalorder %s1440_s29, 2  ;;  %p1314_p10 = scmp.eq.s32.totalorder %s1077_s9, 3 }
 0x492   : > { %p1307_p11 = pnand %p1314_p10, %p1313_p6 }
 0x494   : > { %1427 = dma.done.wait (!%p1307_p11), [#allocation9], 32  }
 0x495   : > { %1429 = vsyncadd (!%p1307_p11), [#allocation9], 4294967264  ;;  %s22_s29 = sadd.s32 1, %s1440_s29   ;;  %s1729_s27 = smov %s1436_s28 }
 0x496   : > { %p19_p12 = scmp.ge.s32.totalorder %s22_s29, 6   ;;  %s1730_s28 = smov %s1732_s10 }
 0x498   :  { %21 = sbr.rel (!%p19_p12) target bundleno = 4 (0x4), region = 122 }
 0x49f   :  { %974 = vsyncpa [#allocation8], 1 }
 0x4a0   :  { %976 = vsyncpa [#allocation8 + $0x1], 1 }
 0x4a1   :  { %977 = vsyncpa [#allocation9], 1 }
 0x4a2   :  { %979 = vsyncpa [#allocation9 + $0x1], 1 }

</bundles_post_ra>
